<compile_context>
chip_gen: v5e
topology: v5e:2x2
jax: 0.10.0
libtpu: 0.0.40
codegen_flags: <defaults>
</compile_context>

<pallas_src>
import functools

import jax
import jax.numpy as jnp
from jax.experimental import pallas as pl
from jax.experimental.pallas import tpu as pltpu


def _round_up(x, m):
    return ((x + m - 1) // m) * m


def _default_tanh_dtype():
    """bf16 tanh on v6e/v7x (bf16 EUP), f32 everywhere else (v5e / interpreter)."""
    try:
        kind = jax.devices()[0].device_kind.lower()
    except Exception:
        return jnp.float32
    if "v6" in kind or "v7" in kind:
        return jnp.bfloat16
    return jnp.float32


def _choose_tile(batch, block_b):
    """Batch tile: >=16 rows (bf16 sublane tile), 128-aligned for big batches,
    and small enough that grid_b >= 2 so v7x can split the batch over 2 TCs."""
    if batch <= 256:
        return _round_up(max(batch, 16), 16)
    tb = max(128, (min(block_b, batch) // 128) * 128)
    while tb > 128 and pl.cdiv(batch, tb) < 2:
        tb = max(128, ((tb // 2) // 128) * 128)
    return tb


def actor_categorical_kernel(x_ref, g_ref, w1_ref, b1_ref, w2_ref, b2_ref,
                             logp_ref, act_ref, logp_act_ref, *, tanh_dtype):
    # hidden = tanh(x @ W1 + b1): cast f32 activations to bf16 at the MXU input,
    # accumulate in f32, tanh in bf16 on chips with a bf16 EUP.
    x = x_ref[...].astype(w1_ref.dtype)
    h32 = jnp.dot(x, w1_ref[...], preferred_element_type=jnp.float32) + b1_ref[...]
    h = jnp.tanh(h32.astype(tanh_dtype))

    # logits over the lane-padded (multiple-of-128) action axis. Padded columns
    # carry a -1e30 bias so they vanish in the logsumexp and never get sampled.
    logits = (
        jnp.dot(h.astype(w2_ref.dtype), w2_ref[...],
                preferred_element_type=jnp.float32)
        + b2_ref[...]
    )

    # Categorical(logits=...) normalization: log_probs = logits - logsumexp.
    m = jnp.max(logits, axis=-1, keepdims=True)
    lse = m + jnp.log(jnp.sum(jnp.exp(logits - m), axis=-1, keepdims=True))
    logp = logits - lse
    logp_ref[...] = logp

    # pi.sample() via Gumbel-max with precomputed (wrapper) noise; first-index
    # tie-break matches torch argmax.  No transcendental work here.
    z = logits + g_ref[...].astype(jnp.float32)
    zmax = jnp.max(z, axis=-1, keepdims=True)
    ids = jax.lax.broadcasted_iota(jnp.int32, z.shape, 1)
    act = jnp.min(jnp.where(z >= zmax, ids, z.shape[-1]), axis=-1, keepdims=True)
    act_ref[...] = act

    # Fused get_log_prob(pi, actions): gather the sampled action's log-prob
    # from data already in vregs.
    logp_act_ref[...] = jnp.sum(jnp.where(ids == act, logp, 0.0),
                                axis=-1, keepdims=True)


def prepare_actor_params(w1, b1, w2, b2, *, mxu_dtype=jnp.bfloat16):
    """Pad/cast the (static) network weights ONCE, outside the per-step path.

    hidden -> multiple of 128 (exact: tanh(0)=0, zero W2 rows); action axis ->
    multiple of 128 lanes with -1e30 bias on the padded columns.
    """
    obs_dim, hidden = w1.shape
    n_actions = w2.shape[1]
    hid_pad = _round_up(hidden, 128)
    n_pad = _round_up(max(n_actions, 128), 128)

    w1p = jnp.zeros((obs_dim, hid_pad), mxu_dtype).at[:, :hidden].set(
        w1.astype(mxu_dtype))
    b1p = jnp.zeros((1, hid_pad), jnp.float32).at[:, :hidden].set(
        jnp.reshape(b1.astype(jnp.float32), (1, hidden)))
    w2p = jnp.zeros((hid_pad, n_pad), mxu_dtype).at[:hidden, :n_actions].set(
        w2.astype(mxu_dtype))
    b2p = jnp.full((1, n_pad), -1e30, jnp.float32).at[:, :n_actions].set(
        jnp.reshape(b2.astype(jnp.float32), (1, n_actions)))
    return (w1p, b1p, w2p, b2p)


def actor_categorical_forward(states, params, rng_key, *, n_actions,
                              block_b=1024, return_log_probs=True):
    """Returns (log_probs[B, n_actions] | None, actions[B], log_prob_of_actions[B])."""
    w1, b1, w2, b2 = params
    B, obs_dim = states.shape
    hid_pad = w1.shape[1]
    n_pad = w2.shape[1]

    tb = _choose_tile(B, block_b)
    Bp = _round_up(B, tb)
    x = states.astype(jnp.float32)
    if Bp != B:
        x = jnp.pad(x, ((0, Bp - B), (0, 0)))

    # Gumbel noise from the host PRNG (pltpu.prng_* is not available under the
    # TPU interpreter); bf16 halves the extra HBM read.  Padded action columns
    # can never win since their logits are -1e30.
    gumbel = jax.random.gumbel(rng_key, (Bp, n_pad), dtype=jnp.bfloat16)

    grid_b = Bp // tb
    kernel = functools.partial(actor_categorical_kernel,
                               tanh_dtype=_default_tanh_dtype())

    logp, act, logp_act = pl.pallas_call(
        kernel,
        out_shape=(
            jax.ShapeDtypeStruct((Bp, n_pad), jnp.float32),  # normalized log-probs (pi)
            jax.ShapeDtypeStruct((Bp, 1), jnp.int32),        # sampled actions
            jax.ShapeDtypeStruct((Bp, 1), jnp.float32),      # log-prob of sampled actions
        ),
        grid=(grid_b,),
        in_specs=[
            pl.BlockSpec((tb, obs_dim), lambda i: (i, 0)),      # activation stream (f32)
            pl.BlockSpec((tb, n_pad), lambda i: (i, 0)),        # gumbel noise stream (bf16)
            pl.BlockSpec((obs_dim, hid_pad), lambda i: (0, 0)),  # W1 resident
            pl.BlockSpec((1, hid_pad), lambda i: (0, 0)),        # b1 resident
            pl.BlockSpec((hid_pad, n_pad), lambda i: (0, 0)),    # W2 resident
            pl.BlockSpec((1, n_pad), lambda i: (0, 0)),          # b2 resident
        ],
        out_specs=(
            pl.BlockSpec((tb, n_pad), lambda i: (i, 0)),
            pl.BlockSpec((tb, 1), lambda i: (i, 0)),
            pl.BlockSpec((tb, 1), lambda i: (i, 0)),
        ),
        compiler_params=pltpu.CompilerParams(
            dimension_semantics=("parallel",),   # batch tiles shard across TCs (v7x)
        ),
    )(x, gumbel, w1, b1, w2, b2)

    actions = act[:B, 0]
    logp_actions = logp_act[:B, 0]
    if return_log_probs:
        return logp[:B, :n_actions], actions, logp_actions
    return None, actions, logp_actions


def get_log_prob(log_probs, actions):
    """Equivalent of ActorCategorical.get_log_prob: pi.log_prob(actions)."""
    return jnp.take_along_axis(log_probs, actions[:, None], axis=-1)[:, 0]


if __name__ == "__main__":
    B, OBS, HID, NACT = 16, 32, 64, 8

    key = jax.random.PRNGKey(0)
    k_x, k_w1, k_b1, k_w2, k_b2, k_noise = jax.random.split(key, 6)

    states = jax.random.normal(k_x, (B, OBS), dtype=jnp.float32)

    # Deterministic synthetic parameters (PyTorch-style uniform fan-in init).
    lim1 = 1.0 / float(jnp.sqrt(OBS))
    lim2 = 1.0 / float(jnp.sqrt(HID))
    w1 = jax.random.uniform(k_w1, (OBS, HID), jnp.float32, -lim1, lim1)
    b1 = jax.random.uniform(k_b1, (1, HID), jnp.float32, -lim1, lim1)
    w2 = jax.random.uniform(k_w2, (HID, NACT), jnp.float32, -lim2, lim2)
    b2 = jax.random.uniform(k_b2, (1, NACT), jnp.float32, -lim2, lim2)

    # Pad/cast weights once (static across a rollout).
    params = prepare_actor_params(w1, b1, w2, b2)

    fwd = jax.jit(actor_categorical_forward,
                  static_argnames=("n_actions", "block_b", "return_log_probs"))
    log_probs, actions, logp_actions = fwd(states, params, k_noise, n_actions=NACT)
    jax.block_until_ready((log_probs, actions, logp_actions))

    # sanity: shapes, normalization, action range, fused log-prob consistency
    assert log_probs.shape == (B, NACT)
    assert actions.shape == (B,)
    assert logp_actions.shape == (B,)
    assert jnp.allclose(jnp.exp(log_probs).sum(-1), 1.0, atol=1e-5)
    assert bool(jnp.all((actions >= 0) & (actions < NACT)))
    assert jnp.allclose(logp_actions, get_log_prob(log_probs, actions), atol=1e-6)

    print("KERNEL_OK")
</pallas_src>

<mosaic_0001>
module attributes {stable_mosaic.version = 11 : i64} {
  func.func @actor_categorical_kernel(%arg0: i32, %arg1: memref<16x32xf32, #tpu.memory_space<vmem>>, %arg2: memref<16x128xbf16, #tpu.memory_space<vmem>>, %arg3: memref<32x128xbf16, #tpu.memory_space<vmem>>, %arg4: memref<1x128xf32, #tpu.memory_space<vmem>>, %arg5: memref<128x128xbf16, #tpu.memory_space<vmem>>, %arg6: memref<1x128xf32, #tpu.memory_space<vmem>>, %arg7: memref<16x128xf32, #tpu.memory_space<vmem>>, %arg8: memref<16x1xi32, #tpu.memory_space<vmem>>, %arg9: memref<16x1xf32, #tpu.memory_space<vmem>>) attributes {dimension_semantics = [#tpu.dimension_semantics<parallel>], iteration_bounds = array<i64: 1>, scalar_prefetch = 0 : i64, scratch_operands = 0 : i64, tpu.core_type = #tpu.core_type<tc>, window_params = [{transform_indices = @transform_0, window_bounds = array<i64: 16, 32>}, {transform_indices = @transform_1, window_bounds = array<i64: 16, 128>}, {pipeline_mode = #tpu.pipeline_mode<synchronous>, transform_indices = @transform_2, window_bounds = array<i64: 32, 128>}, {pipeline_mode = #tpu.pipeline_mode<synchronous>, transform_indices = @transform_3, window_bounds = array<i64: 1, 128>}, {pipeline_mode = #tpu.pipeline_mode<synchronous>, transform_indices = @transform_4, window_bounds = array<i64: 128, 128>}, {pipeline_mode = #tpu.pipeline_mode<synchronous>, transform_indices = @transform_5, window_bounds = array<i64: 1, 128>}, {transform_indices = @transform_6, window_bounds = array<i64: 16, 128>}, {transform_indices = @transform_7, window_bounds = array<i64: 16, 1>}, {transform_indices = @transform_8, window_bounds = array<i64: 16, 1>}]} {
    %c0 = arith.constant 0 : index
    %c0_0 = arith.constant 0 : index
    %0 = vector.load %arg1[%c0, %c0_0] : memref<16x32xf32, #tpu.memory_space<vmem>>, vector<16x32xf32>
    %1 = arith.truncf %0 : vector<16x32xf32> to vector<16x32xbf16>
    %c0_1 = arith.constant 0 : index
    %c0_2 = arith.constant 0 : index
    %2 = vector.load %arg3[%c0_1, %c0_2] : memref<32x128xbf16, #tpu.memory_space<vmem>>, vector<32x128xbf16>
    %cst = arith.constant dense<0.000000e+00> : vector<16x128xf32>
    %3 = tpu.matmul %1, %2, %cst {dimension_numbers = #tpu.dot_dimension_numbers<[1], [0], [0], [1], [0, 0, 1, 1], [], []>} : vector<16x32xbf16>, vector<32x128xbf16>, vector<16x128xf32> -> vector<16x128xf32>
    %c0_3 = arith.constant 0 : index
    %c0_4 = arith.constant 0 : index
    %4 = vector.load %arg4[%c0_3, %c0_4] : memref<1x128xf32, #tpu.memory_space<vmem>>, vector<1x128xf32>
    %5 = vector.broadcast %4 : vector<1x128xf32> to vector<16x128xf32>
    %6 = arith.addf %3, %5 : vector<16x128xf32>
    %7 = math.tanh %6 : vector<16x128xf32>
    %8 = arith.truncf %7 : vector<16x128xf32> to vector<16x128xbf16>
    %c0_5 = arith.constant 0 : index
    %c0_6 = arith.constant 0 : index
    %9 = vector.load %arg5[%c0_5, %c0_6] : memref<128x128xbf16, #tpu.memory_space<vmem>>, vector<128x128xbf16>
    %cst_7 = arith.constant dense<0.000000e+00> : vector<16x128xf32>
    %10 = tpu.matmul %8, %9, %cst_7 {dimension_numbers = #tpu.dot_dimension_numbers<[1], [0], [0], [1], [0, 0, 1, 1], [], []>} : vector<16x128xbf16>, vector<128x128xbf16>, vector<16x128xf32> -> vector<16x128xf32>
    %c0_8 = arith.constant 0 : index
    %c0_9 = arith.constant 0 : index
    %11 = vector.load %arg6[%c0_8, %c0_9] : memref<1x128xf32, #tpu.memory_space<vmem>>, vector<1x128xf32>
    %12 = vector.broadcast %11 : vector<1x128xf32> to vector<16x128xf32>
    %13 = arith.addf %10, %12 : vector<16x128xf32>
    %cst_10 = arith.constant dense<0xFF800000> : vector<16xf32>
    %14 = vector.multi_reduction <maximumf>, %13, %cst_10 [1] : vector<16x128xf32> to vector<16xf32>
    %15 = vector.shape_cast %14 : vector<16xf32> to vector<16x1xf32>
    %16 = vector.broadcast %15 : vector<16x1xf32> to vector<16x128xf32>
    %17 = arith.subf %13, %16 : vector<16x128xf32>
    %18 = math.exp %17 : vector<16x128xf32>
    %cst_11 = arith.constant dense<0.000000e+00> : vector<16xf32>
    %19 = vector.multi_reduction <add>, %18, %cst_11 [1] : vector<16x128xf32> to vector<16xf32>
    %20 = vector.shape_cast %19 : vector<16xf32> to vector<16x1xf32>
    %21 = math.log %20 : vector<16x1xf32>
    %22 = arith.addf %15, %21 : vector<16x1xf32>
    %23 = vector.broadcast %22 : vector<16x1xf32> to vector<16x128xf32>
    %24 = arith.subf %13, %23 : vector<16x128xf32>
    %c0_12 = arith.constant 0 : index
    %c0_13 = arith.constant 0 : index
    %25 = vector.load %arg7[%c0_12, %c0_13] : memref<16x128xf32, #tpu.memory_space<vmem>>, vector<16x128xf32>
    tpu.vector_store %arg7[%c0_12, %c0_13], %24 {strides = array<i32>} : memref<16x128xf32, #tpu.memory_space<vmem>>, vector<16x128xf32>,
    %c0_14 = arith.constant 0 : index
    %c0_15 = arith.constant 0 : index
    %26 = vector.load %arg2[%c0_14, %c0_15] : memref<16x128xbf16, #tpu.memory_space<vmem>>, vector<16x128xbf16>
    %27 = arith.extf %26 : vector<16x128xbf16> to vector<16x128xf32>
    %28 = arith.addf %13, %27 : vector<16x128xf32>
    %cst_16 = arith.constant dense<0xFF800000> : vector<16xf32>
    %29 = vector.multi_reduction <maximumf>, %28, %cst_16 [1] : vector<16x128xf32> to vector<16xf32>
    %30 = vector.shape_cast %29 : vector<16xf32> to vector<16x1xf32>
    %31 = tpu.iota {dimensions = array<i32: 1>} : vector<16x128xi32>
    %32 = vector.broadcast %30 : vector<16x1xf32> to vector<16x128xf32>
    %33 = arith.cmpf oge, %28, %32 : vector<16x128xf32>
    %c128_i32 = arith.constant 128 : i32
    %34 = vector.broadcast %c128_i32 : i32 to vector<16x128xi32>
    %35 = arith.select %33, %31, %34 : vector<16x128xi1>, vector<16x128xi32>
    %cst_17 = arith.constant dense<2147483647> : vector<16xi32>
    %36 = vector.multi_reduction <minsi>, %35, %cst_17 [1] : vector<16x128xi32> to vector<16xi32>
    %37 = vector.shape_cast %36 : vector<16xi32> to vector<16x1xi32>
    %c0_18 = arith.constant 0 : index
    %c0_19 = arith.constant 0 : index
    %38 = vector.load %arg8[%c0_18, %c0_19] : memref<16x1xi32, #tpu.memory_space<vmem>>, vector<16x1xi32>
    tpu.vector_store %arg8[%c0_18, %c0_19], %37 {strides = array<i32>} : memref<16x1xi32, #tpu.memory_space<vmem>>, vector<16x1xi32>,
    %39 = vector.broadcast %37 : vector<16x1xi32> to vector<16x128xi32>
    %40 = arith.cmpi eq, %31, %39 : vector<16x128xi32>
    %cst_20 = arith.constant 0.000000e+00 : f32
    %41 = vector.broadcast %cst_20 : f32 to vector<16x128xf32>
    %42 = arith.select %40, %24, %41 : vector<16x128xi1>, vector<16x128xf32>
    %cst_21 = arith.constant dense<0.000000e+00> : vector<16xf32>
    %43 = vector.multi_reduction <add>, %42, %cst_21 [1] : vector<16x128xf32> to vector<16xf32>
    %44 = vector.shape_cast %43 : vector<16xf32> to vector<16x1xf32>
    %c0_22 = arith.constant 0 : index
    %c0_23 = arith.constant 0 : index
    %45 = vector.load %arg9[%c0_22, %c0_23] : memref<16x1xf32, #tpu.memory_space<vmem>>, vector<16x1xf32>
    tpu.vector_store %arg9[%c0_22, %c0_23], %44 {strides = array<i32>} : memref<16x1xf32, #tpu.memory_space<vmem>>, vector<16x1xf32>,
    return
  }
  func.func @transform_0(%arg0: i32) -> (i32, i32) {
    %c0_i32 = arith.constant 0 : i32
    %c0_i32_0 = arith.constant 0 : i32
    return %arg0, %c0_i32 : i32, i32
  }
  func.func @transform_1(%arg0: i32) -> (i32, i32) {
    %c0_i32 = arith.constant 0 : i32
    %c0_i32_0 = arith.constant 0 : i32
    return %arg0, %c0_i32 : i32, i32
  }
  func.func @transform_2(%arg0: i32) -> (i32, i32) {
    %c0_i32 = arith.constant 0 : i32
    %c0_i32_0 = arith.constant 0 : i32
    %c0_i32_1 = arith.constant 0 : i32
    return %c0_i32, %c0_i32_0 : i32, i32
  }
  func.func @transform_3(%arg0: i32) -> (i32, i32) {
    %c0_i32 = arith.constant 0 : i32
    %c0_i32_0 = arith.constant 0 : i32
    %c0_i32_1 = arith.constant 0 : i32
    return %c0_i32, %c0_i32_0 : i32, i32
  }
  func.func @transform_4(%arg0: i32) -> (i32, i32) {
    %c0_i32 = arith.constant 0 : i32
    %c0_i32_0 = arith.constant 0 : i32
    %c0_i32_1 = arith.constant 0 : i32
    return %c0_i32, %c0_i32_0 : i32, i32
  }
  func.func @transform_5(%arg0: i32) -> (i32, i32) {
    %c0_i32 = arith.constant 0 : i32
    %c0_i32_0 = arith.constant 0 : i32
    %c0_i32_1 = arith.constant 0 : i32
    return %c0_i32, %c0_i32_0 : i32, i32
  }
  func.func @transform_6(%arg0: i32) -> (i32, i32) {
    %c0_i32 = arith.constant 0 : i32
    %c0_i32_0 = arith.constant 0 : i32
    return %arg0, %c0_i32 : i32, i32
  }
  func.func @transform_7(%arg0: i32) -> (i32, i32) {
    %c0_i32 = arith.constant 0 : i32
    %c0_i32_0 = arith.constant 0 : i32
    return %arg0, %c0_i32 : i32, i32
  }
  func.func @transform_8(%arg0: i32) -> (i32, i32) {
    %c0_i32 = arith.constant 0 : i32
    %c0_i32_0 = arith.constant 0 : i32
    return %arg0, %c0_i32 : i32, i32
  }
}

</mosaic_0001>

<bundles_post_ra>
// kernel: actor_categorical_forward.1
= control target key start
LH: loop header
LB: loop body
LE: loop exit
PB: predicated region body
PF: predicated region fallthrough
CT: control target
= control target key end

     0   :  { %14 = vsyncpa [#allocation3], 0  ;;  %s503_s0 = inlined_call_operand.vmem [shape: f32[16,32], index: 0, kind: input, shape index: {}]   ;;  %s504_s1 = inlined_call_operand.vmem [shape: bf16[16,128], index: 1, kind: input, shape index: {}]   ;;  %s505_s2 = inlined_call_operand.hbm [shape: bf16[32,128], index: 2, kind: input, shape index: {}]   ;;  %s506_s3 = inlined_call_operand.vmem [shape: f32[1,128], index: 3, kind: input, shape index: {}]   ;;  %s507_s4 = inlined_call_operand.hbm [shape: bf16[128,128], index: 4, kind: input, shape index: {}]   ;;  %s508_s5 = inlined_call_operand.vmem [shape: f32[1,128], index: 5, kind: input, shape index: {}]   ;;  %s509_s6 = inlined_call_operand.vmem [shape: f32[16,128], index: 6, kind: output, shape index: {0}]   ;;  %s510_s7 = inlined_call_operand.vmem [shape: s32[16,1], index: 7, kind: output, shape index: {1}]   ;;  %s511_s8 = inlined_call_operand.vmem [shape: f32[16,1], index: 8, kind: output, shape index: {2}]  }
   0x1   :  { %s24_s29 = sshll.u32 %s505_s2, 4  ;;  %s25_s29 = int_to_ptr.hbm [resolvable:$true] %s24_s29 }
   0x2   :  { %15 = vsyncpa [#allocation5], 0  ;;  %s405_s30 = smov [#allocation2]   ;;  %s39_s12 = sshll.u32 %s507_s4, 4  ;;  %s40_s12 = int_to_ptr.hbm [resolvable:$true] %s39_s12 }
   0x3   :  { %s26_s9 = sshll.u32 %s405_s30, 4  ;;  %s406_s13 = smov 64   ;;  %s27_s9 = int_to_ptr.vmem [resolvable:$true] %s26_s9 }
   0x4   :  { %s407_s14 = smov 4   ;;  %s408_s15 = smov [#allocation4]  }
   0x5   :  { %32 = dma.hbm_to_vmem [thread:$0]  %s25_s29, 256, %s27_s9, [#allocation3], %s406_s13, %s406_s13, %s407_s14  }
   0x6   :  { %s41_s16 = sshll.u32 %s408_s15, 4  ;;  %s42_s16 = int_to_ptr.vmem [resolvable:$true] %s41_s16 }
   0x7   :  { %47 = dma.hbm_to_vmem [thread:$0]  %s40_s12, 1024, %s42_s16, [#allocation5], %s406_s13, %s406_s13, %s407_s14  }
   0x8   :  { %401 = dma.done.wait [#allocation3], 256  }
   0x9   :  { %402 = vsyncadd [#allocation3], 4294967040 }
   0xa   :  { %403 = dma.done.wait [#allocation5], 1024  }
   0xb   :  { %404 = vsyncadd [#allocation5], 4294966272  ;;  %v322_v0 = vld [vmem:[#allocation2 + $0x8] sm:$0xff]  ;;  %v321_v1 = vld [vmem:[#allocation2] sm:$0xff]  ;;  %vm82_vm0 = vcmask 261120   ;;  %v219_v31 = vlaneseq  ;;  %vm253_vm5 = vcmask 7168  }
   0xc   :  { %v330_v2 = vld [vmem:[#allocation4 + $0x38] sm:$0xff]  ;;  %92 = vmatpush.bf16.msra.mxu0 %v322_v0  ;;  %v59_v3 = vld [vmem:[%s503_s0] sm:$0xff]  ;;  %v328_v7 = vld [vmem:[#allocation4 + $0x28] sm:$0xff] }
   0xd   :  { %v60_v4 = vld [vmem:[%s503_s0 + $0x8] sm:$0xff]  ;;  %171 = vmatpush.bf16.msra.mxu1 %v330_v2  ;;  %v329_v5 = vld [vmem:[#allocation4 + $0x30] sm:$0xff]  ;;  %v327_v8 = vld [vmem:[#allocation4 + $0x20] sm:$0xff]  ;;  %v475_v33 = vand.u32 127, %v219_v31 }
   0xe   :  { %v61_v6 = vpack.c.bf16 %v60_v4, %v59_v3  ;;  %v326_v9 = vld [vmem:[#allocation4 + $0x18] sm:$0xff]  ;;  %v325_v10 = vld [vmem:[#allocation4 + $0x10] sm:$0xff]  ;;  %v324_v11 = vld [vmem:[#allocation4 + $0x8] sm:$0xff] }
   0xf   :  { %v323_v12 = vld [vmem:[#allocation4] sm:$0xff]  ;;  %v339_v14 = vld [vmem:[%s506_s3] ss:$0 sm:$0xff] }
  0x10   :  { %93 = vmatpush.bf16.msra.mxu0 %v321_v1  ;;  %v332_v21 = vld [vmem:[%s504_s1] sm:$0xff]  }
  0x11   :  { %172 = vmatpush.bf16.msra.mxu1 %v329_v5  ;;  %v340_v22 = vld [vmem:[%s508_s5] ss:$0 sm:$0xff]  ;;  %v333_v23 = vunpack.c.l.bf16 %v332_v21  ;;  %v334_v27 = vunpack.c.h.bf16 %v332_v21 }
  0x13   :  { %288 = vmatmul.msk.bf16.vlgmr.msra.gmra.mxu0 %vm82_vm0, %v61_v6 }
  0x15   :  { %173 = vmatpush.bf16.msra.mxu1 %v328_v7 }
  0x19   :  { %174 = vmatpush.bf16.msra.mxu1 %v327_v8 }
  0x1d   :  { %175 = vmatpush.bf16.msra.mxu1 %v326_v9 }
  0x21   :  { %176 = vmatpush.bf16.msra.mxu1 %v325_v10 }
  0x25   :  { %177 = vmatpush.bf16.msra.mxu1 %v324_v11 }
  0x29   :  { %178 = vmatpush.bf16.msra.mxu1 %v323_v12 }
  0x90   :  { %v95_v13 = vpop.f32.mrf.mxu0 }
  0x91   :  { %v96_v15 = vadd.f32 %v339_v14, %v95_v13 }
  0x93   :  { %341 = vtanh.f32 %v96_v15 }
  0x98   :  { %v97_v16 = vpop.f32.mrf.mxu0 }
  0x99   :  { %v98_v17 = vadd.f32 %v339_v14, %v97_v16  ;;  %v342_v18 = vpop.eup %341 }
  0x9b   :  { %343 = vtanh.f32 %v98_v17 }
  0xa1   :  { %v344_v19 = vpop.eup %343 }
  0xa2   :  { %v102_v20 = vpack.c.bf16 %v344_v19, %v342_v18 }
  0xa4   :  { %179 = vmatmul.bf16.vlgmr.msra.gmra.mxu1 %v102_v20 }
 0x121   :  { %v180_v24 = vpop.f32.mrf.mxu1 }
 0x122   :  { %v181_v25 = vadd.f32 %v340_v22, %v180_v24 }
 0x124   :  { %185 = vmax.xlane.f32.xlu1 %v181_v25  ;;  %v213_v26 = vadd.f32 %v333_v23, %v181_v25 }
 0x126   :  { %215 = vmax.xlane.f32.xlu0 %v213_v26 }
 0x129   :  { %v182_v28 = vpop.f32.mrf.mxu1 }
 0x12a   :  { %v183_v29 = vadd.f32 %v340_v22, %v182_v28 }
 0x12c   :  { %187 = vmax.xlane.f32.xlu1 %v183_v29  ;;  %v214_v30 = vadd.f32 %v334_v27, %v183_v29 }
 0x12e   :  { %217 = vmax.xlane.f32.xlu0 %v214_v30 }
 0x197   :  { %v186_v32 = vpop.xlane.xlu1 %185 }
 0x198   :  { %v189_v34 = vsub.f32 %v181_v25, %v186_v32 }
 0x199   :  { %v216_v35 = vpop.xlane.xlu0 %215 }
 0x19a   :  { %v191_v36 = vmul.f32 1.442695, %v189_v34  ;;  %vm221_vm1 = vcmp.ge.f32.partialorder %v213_v26, %v216_v35 }
 0x19b   :  { %v223_v37 = vsel %vm221_vm1, %v475_v33, 128 }
 0x19c   :  { %345 = vpow2.f32 %v191_v36  ;;  %v226_v38 = vshra.s32 %v223_v37, 16  ;;  %v225_v49 = vand.u32 65535, %v223_v37 }
 0x19e   :  { %v228_v39 = vcvt.s32.f32 %v226_v38  ;;  %v227_v51 = vcvt.s32.f32 %v225_v49 }
 0x19f   :  { %v188_v40 = vpop.xlane.xlu1 %187 }
 0x1a0   :  { %v190_v41 = vsub.f32 %v183_v29, %v188_v40  ;;  %229 = vmin.xlane.f32.xlu2 %v228_v39 }
 0x1a1   :  { %v218_v42 = vpop.xlane.xlu0 %217 }
 0x1a2   :  { %v346_v43 = vpop.eup %345  ;;  %v193_v44 = vmul.f32 1.442695, %v190_v41  ;;  %vm222_vm2 = vcmp.ge.f32.partialorder %v214_v30, %v218_v42 }
 0x1a3   :  { %v224_v45 = vsel %vm222_vm2, %v475_v33, 128  ;;  %195 = vadd.xlane.f32.xlu0 %v346_v43 }
 0x1a4   :  { %347 = vpow2.f32 %v193_v44  ;;  %v240_v46 = vshra.s32 %v224_v45, 16  ;;  %v239_v54 = vand.u32 65535, %v224_v45 }
 0x1a6   :  { %v242_v47 = vcvt.s32.f32 %v240_v46  ;;  %v241_v56 = vcvt.s32.f32 %v239_v54 }
 0x1a8   :  { %243 = vmin.xlane.f32.xlu2 %v242_v47 }
 0x1aa   :  { %v348_v48 = vpop.eup %347 }
 0x1ab   :  { %197 = vadd.xlane.f32.xlu1 %v348_v48 }
 0x213   :  { %v230_v50 = vpop.xlane.xlu2 %229 }
 0x214   :  { %vm231_vm3 = vcmp.eq.f32.partialorder %v228_v39, %v230_v50  ;;  %v236_v3 = vcvt.f32.s32 %v230_v50 }
 0x215   :  { %v232_v52 = vsel %vm231_vm3, %v227_v51, inf }
 0x216   :  { %233 = vmin.xlane.f32.xlu2 %v232_v52  ;;  %v196_v53 = vpop.xlane.xlu0 %195  ;;  %v237_v5 = vshll.u32 %v236_v3, 16 }
 0x217   :  { %349 = vlog2.f32 %v196_v53 }
 0x21b   :  { %v244_v55 = vpop.xlane.xlu2 %243 }
 0x21c   :  { %vm245_vm4 = vcmp.eq.f32.partialorder %v242_v47, %v244_v55  ;;  %v250_v8 = vcvt.f32.s32 %v244_v55 }
 0x21d   :  { %v350_v57 = vpop.eup %349  ;;  %v246_v58 = vsel %vm245_vm4, %v241_v56, inf }
 0x21e   :  { %v200_v59 = vmul.f32 0.6931472, %v350_v57  ;;  %v198_v60 = vpop.xlane.xlu1 %197  ;;  %247 = vmin.xlane.f32.xlu0 %v246_v58  ;;  %v251_v11 = vshll.u32 %v250_v8, 16 }
 0x21f   :  { %351 = vlog2.f32 %v198_v60 }
 0x220   :  { %v203_v61 = vadd.f32 %v200_v59, %v186_v32 }
 0x222   :  { %v205_v62 = vsub.f32 %v181_v25, %v203_v61 }
 0x224   :  { %207 = vst [vmem:[%s509_s6] sm:$0xff] %v205_v62 }
 0x225   :  { %v352_v63 = vpop.eup %351 }
 0x226   :  { %v202_v0 = vmul.f32 0.6931472, %v352_v63 }
 0x228   :  { %v204_v1 = vadd.f32 %v202_v0, %v188_v40 }
 0x22a   :  { %v206_v2 = vsub.f32 %v183_v29, %v204_v1 }
 0x22c   :  { %208 = vst [vmem:[%s509_s6 + $0x8] sm:$0xff] %v206_v2 }
 0x289   :  { %v234_v4 = vpop.xlane.xlu2 %233 }
 0x28a   :  { %v235_v6 = vcvt.f32.s32 %v234_v4 }
 0x28c   :  { %v238_v7 = vadd.s32 %v237_v5, %v235_v6 }
 0x28e   :  { %vm256_vm6 = vcmp.eq.s32.totalorder %v475_v33, %v238_v7  ;;  %254 = vst.msk [vmem:[%s510_s7] sm:$0xff] %vm253_vm5, %v238_v7 }
 0x28f   :  { %v258_v9 = vsel %vm256_vm6, %v205_v62, 0.0 }
 0x290   :  { %260 = vadd.xlane.f32.xlu1 %v258_v9 }
 0x291   :  { %v248_v10 = vpop.xlane.xlu0 %247 }
 0x292   :  { %v249_v12 = vcvt.f32.s32 %v248_v10 }
 0x294   :  { %v252_v13 = vadd.s32 %v251_v11, %v249_v12 }
 0x296   :  { %vm257_vm7 = vcmp.eq.s32.totalorder %v475_v33, %v252_v13  ;;  %255 = vst.msk [vmem:[%s510_s7 + $0x8] sm:$0xff] %vm253_vm5, %v252_v13 }
 0x297   :  { %v259_v14 = vsel %vm257_vm7, %v206_v2, 0.0 }
 0x298   :  { %262 = vadd.xlane.f32.xlu2 %v259_v14 }
 0x303   :  { %v261_v15 = vpop.xlane.xlu1 %260 }
 0x304   :  { %264 = vst.msk [vmem:[%s511_s8] sm:$0xff] %vm253_vm5, %v261_v15 }
 0x30b   :  { %v263_v16 = vpop.xlane.xlu2 %262 }
 0x30c   :  { %265 = vst.msk [vmem:[%s511_s8 + $0x8] sm:$0xff] %vm253_vm5, %v263_v16 }
 0x30d   :  { %278 = vsyncpa [#allocation3], 1 }
 0x30e   :  { %279 = vsyncpa [#allocation5], 1 }

</bundles_post_ra>
